<compile_context>
chip_gen: v7x
topology: tpu7x:2x2x1
jax: 0.10.0
libtpu: 0.0.40
codegen_flags: <defaults>
</compile_context>

<pallas_src>
import functools

import jax
import jax.numpy as jnp
from jax import lax
from jax.experimental import pallas as pl
from jax.experimental.pallas import tpu as pltpu


# ----------------------------- Pallas kernel ----------------------------------

def _lrconv_kernel(x_ref, wb_ref, a_ref, b_ref, g_ref, bt_ref, o_ref, xpad_ref, *,
                   k, s, p, td, Ho, eps, alpha):
    """One grid step = one (sample, depth-block) slab of td output depths.

    x_ref   : (1, D, H, W*Cin)        unpadded channels-last sample, bf16 (resident across depth)
    wb_ref  : (k*k*W*Cin, Wo*Cout)    banded conv weights (kw, Cin folded in), bf16
    a_ref   : (Wo*Cout, Wo*Cout)      block-diagonal averaging matrix for LN over W, f32
    b_ref   : (1, Wo*Cout)            conv bias, flattened as b[co] at lane wo*Cout+co
    g_ref   : (1, Wo*Cout)            LN gamma, gamma[wo] at lane wo*Cout+co
    bt_ref  : (1, Wo*Cout)            LN beta
    o_ref   : (1, td, Ho, Wo*Cout)    output block (lane-dense, last dim multiple of 128)
    xpad_ref: (D+2p, H+2p, W*Cin)     f32 VMEM scratch holding the zero-padded sample
    """
    d_blk = pl.program_id(1)
    D = x_ref.shape[1]
    H = x_ref.shape[2]
    WC = x_ref.shape[3]              # = W * Cin  (lane axis of the resident sample)
    WoC = o_ref.shape[3]             # = Wo * Cout (lane axis of the output)

    # ---- in-kernel zero padding: fill the halo scratch once per sample ---------------------
    # (the x block index only depends on the sample axis, so Pallas DMAs it once per sample;
    #  W padding needs no halo because the banded weights simply have no entries for
    #  out-of-range w, so multiplying against real data columns never happens for those taps)
    @pl.when(d_blk == 0)
    def _():
        xpad_ref[...] = jnp.zeros_like(xpad_ref)
        for dz in range(D):          # per-plane copy keeps vreg pressure bounded
            xpad_ref[p + dz, p:p + H, :] = x_ref[0, dz].astype(jnp.float32)

    # ---- conv as ONE MXU dot ----------------------------------------------------------------
    # lhs rows  = (dd, ho) output pixels of this depth block
    # lhs lanes = (kd, kh) shifted row-slabs of the padded sample, concatenated; each slab's
    #             lane axis is the flattened (w, c) which the banded weights contract against.
    d0 = d_blk * td * s
    slabs = []
    for kd in range(k):
        for kh in range(k):
            if s == 1:
                dsl = pl.ds(d0 + kd, td)
                hsl = slice(kh, kh + Ho)
            else:
                dsl = pl.ds(d0 + kd, td, stride=s)
                hsl = slice(kh, kh + (Ho - 1) * s + 1, s)
            slabs.append(xpad_ref[dsl, hsl, :].reshape(td * Ho, WC))
    lhs = jnp.concatenate(slabs, axis=-1).astype(jnp.bfloat16)          # (td*Ho, k*k*W*Cin)

    y = jnp.dot(lhs, wb_ref[...], preferred_element_type=jnp.float32)   # (td*Ho, Wo*Cout) f32
    y = y + b_ref[...]                                                   # conv bias

    # ---- LayerNorm over W, entirely in the lane-dense flattened layout ---------------------
    # mean/var per (row, co) broadcast over wo via y @ A  (A is block-diagonal 1/Wo * I_Cout),
    # so no cross-lane relayout is needed and the stats ride the otherwise-idle MXU.
    mean = jnp.dot(y, a_ref[...], preferred_element_type=jnp.float32)
    cen = y - mean
    var = jnp.dot(cen * cen, a_ref[...], preferred_element_type=jnp.float32)
    yn = cen * lax.rsqrt(var + eps)                                      # EUP rsqrt
    yn = yn * g_ref[...] + bt_ref[...]                                   # affine over W

    # ---- LeakyReLU + lane-dense store --------------------------------------------------------
    o_ref[0] = jnp.where(yn >= 0, yn, alpha * yn).reshape(td, Ho, WoC)


# ----------------------------- wrapper -----------------------------------------

def _build_banded_weights(w, *, W, Wo, s, p):
    """(Cout, Cin, kd, kh, kw) -> (k*k*W*Cin, Wo*Cout) banded matrix.

    Row index ((kd*k + kh)*W + w_in)*Cin + c carries w[co, c, kd, kh, kw] at column wo*Cout+co
    whenever w_in == wo*s + kw - p lies inside [0, W); out-of-range taps (the W zero padding)
    simply have no entry.  Built once at parameter-prep time (tiny).
    """
    Cout, Cin, k, _, _ = w.shape
    wt = jnp.transpose(w, (2, 3, 4, 1, 0))                    # (kd, kh, kw, Cin, Cout)
    wb = jnp.zeros((k, k, W, Cin, Wo, Cout), jnp.float32)
    for kw in range(k):
        for wo in range(Wo):
            w_in = wo * s + kw - p
            if 0 <= w_in < W:
                wb = wb.at[:, :, w_in, :, wo, :].set(wt[:, :, kw, :, :])
    return wb.reshape(k * k * W * Cin, Wo * Cout)


def lr_conv_block_3d(x, w, b, gamma, beta, *, stride=1, eps=1e-5, negative_slope=0.2,
                     depth_block=None):
    """x: (N, Cin, D, H, W) f32 (PyTorch NCDHW).  Returns (N, Cout, Do, Ho, Wo) f32."""
    N, Cin, D, H, W = x.shape
    Cout, Cin_w, k, _, _ = w.shape
    assert Cin_w == Cin
    p = 1                                    # module hard-codes padding=1
    Do = (D + 2 * p - k) // stride + 1
    Ho = (H + 2 * p - k) // stride + 1
    Wo = (W + 2 * p - k) // stride + 1
    assert gamma.shape == (Wo,) and beta.shape == (Wo,), \
        "LayerNorm(input_size) must match the conv output width"

    td = min(depth_block or min(Do, 8), Do)
    while Do % td:                           # make the depth block divide Do
        td -= 1

    WC = W * Cin
    WoC = Wo * Cout

    # layout glue: NCDHW -> channels-last with (W, Cin) flattened onto the lane axis, bf16 for
    # the MXU.  One fused transpose+cast; zero padding happens in-kernel (no padded HBM copy).
    x_cl = jnp.transpose(x, (0, 2, 3, 4, 1)).reshape(N, D, H, WC).astype(jnp.bfloat16)

    # parameter prep (would live at init/load time in a real model)
    wb = _build_banded_weights(w, W=W, Wo=Wo, s=stride, p=p).astype(jnp.bfloat16)
    a_mat = jnp.tile(jnp.eye(Cout, dtype=jnp.float32), (Wo, Wo)) / Wo           # (WoC, WoC)
    b_flat = jnp.tile(b.astype(jnp.float32), Wo).reshape(1, WoC)
    g_flat = jnp.repeat(gamma.astype(jnp.float32), Cout).reshape(1, WoC)
    bt_flat = jnp.repeat(beta.astype(jnp.float32), Cout).reshape(1, WoC)

    kernel = functools.partial(_lrconv_kernel, k=k, s=stride, p=p, td=td, Ho=Ho,
                               eps=eps, alpha=negative_slope)

    out = pl.pallas_call(
        kernel,
        out_shape=jax.ShapeDtypeStruct((N, Do, Ho, WoC), jnp.float32),
        grid=(N, Do // td),
        in_specs=[
            # unpadded channels-last sample; same block across the depth axis -> DMA'd once
            # per sample and revisited (the in-kernel halo scratch is filled at d_blk == 0)
            pl.BlockSpec((1, D, H, WC), lambda n, d: (n, 0, 0, 0)),
            pl.BlockSpec((k * k * WC, WoC), lambda n, d: (0, 0)),
            pl.BlockSpec((WoC, WoC), lambda n, d: (0, 0)),
            pl.BlockSpec((1, WoC), lambda n, d: (0, 0)),
            pl.BlockSpec((1, WoC), lambda n, d: (0, 0)),
            pl.BlockSpec((1, WoC), lambda n, d: (0, 0)),
        ],
        out_specs=pl.BlockSpec((1, td, Ho, WoC), lambda n, d: (n, d, 0, 0)),
        scratch_shapes=[pltpu.VMEM((D + 2 * p, H + 2 * p, WC), jnp.float32)],
        compiler_params=pltpu.CompilerParams(
            dimension_semantics=("parallel", "arbitrary"),
            vmem_limit_bytes=32 * 1024 * 1024),
    )(x_cl, wb, a_mat, b_flat, g_flat, bt_flat)

    # (N, Do, Ho, Wo*Cout) -> (N, Cout, Do, Ho, Wo).
    out = out.reshape(N, Do, Ho, Wo, Cout)
    return jnp.transpose(out, (0, 4, 1, 2, 3))


# ----------------------------- pure-JAX reference ------------------------------

def reference(x, w, b, gamma, beta, *, stride=1, eps=1e-5, negative_slope=0.2):
    dn = lax.conv_dimension_numbers(x.shape, w.shape, ("NCDHW", "OIDHW", "NCDHW"))
    y = lax.conv_general_dilated(x, w, (stride,) * 3, [(1, 1)] * 3,
                                 dimension_numbers=dn,
                                 precision=lax.Precision.HIGHEST)
    y = y + b[None, :, None, None, None]
    mean = y.mean(axis=-1, keepdims=True)
    var = ((y - mean) ** 2).mean(axis=-1, keepdims=True)
    y = (y - mean) / jnp.sqrt(var + eps)
    y = y * gamma + beta
    return jnp.where(y >= 0, y, negative_slope * y)


# ----------------------------- main ---------------------------------------------

if __name__ == "__main__":
    # LRconvBlock3D(input_size=8, in_c=4, n=16, k_size=3, stride=1)
    N, Cin, D, H, W = 2, 4, 8, 8, 8
    Cout, k_size, stride = 16, 3, 1
    p = 1
    Wo = (W + 2 * p - k_size) // stride + 1        # = 8 == input_size for LayerNorm

    key = jax.random.PRNGKey(0)
    ks = jax.random.split(key, 5)
    x = jax.random.normal(ks[0], (N, Cin, D, H, W), jnp.float32)
    w = jax.random.normal(ks[1], (Cout, Cin, k_size, k_size, k_size), jnp.float32) * 0.1
    b = 0.1 * jax.random.normal(ks[2], (Cout,), jnp.float32)
    gamma = 1.0 + 0.1 * jax.random.normal(ks[3], (Wo,), jnp.float32)
    beta = 0.1 * jax.random.normal(ks[4], (Wo,), jnp.float32)

    fwd = jax.jit(functools.partial(lr_conv_block_3d, stride=stride, depth_block=4))
    out = jax.block_until_ready(fwd(x, w, b, gamma, beta))

    ref = jax.block_until_ready(reference(x, w, b, gamma, beta, stride=stride))

    assert out.shape == ref.shape == (N, Cout, D, H, W), (out.shape, ref.shape)
    err = float(jnp.max(jnp.abs(out - ref)))
    # bf16 MXU inputs (x, conv weights) vs the f32 HIGHEST-precision reference dominate the error.
    assert err < 1e-1, f"max abs error too large: {err}"
    print("KERNEL_OK")
</pallas_src>

<mosaic_0001>
module attributes {stable_mosaic.version = 11 : i64} {
  func.func @_lrconv_kernel(%arg0: i32, %arg1: i32, %arg2: memref<1x8x8x32xbf16, #tpu.memory_space<vmem>>, %arg3: memref<288x128xbf16, #tpu.memory_space<vmem>>, %arg4: memref<128x128xf32, #tpu.memory_space<vmem>>, %arg5: memref<1x128xf32, #tpu.memory_space<vmem>>, %arg6: memref<1x128xf32, #tpu.memory_space<vmem>>, %arg7: memref<1x128xf32, #tpu.memory_space<vmem>>, %arg8: memref<1x4x8x128xf32, #tpu.memory_space<vmem>>, %arg9: memref<10x10x32xf32, #tpu.memory_space<vmem>>) attributes {dimension_semantics = [#tpu.dimension_semantics<parallel>, #tpu.dimension_semantics<arbitrary>], iteration_bounds = array<i64: 2, 2>, scalar_prefetch = 0 : i64, scratch_operands = 1 : i64, tpu.core_type = #tpu.core_type<tc>, window_params = [{transform_indices = @transform_0, window_bounds = array<i64: 1, 8, 8, 32>}, {pipeline_mode = #tpu.pipeline_mode<synchronous>, transform_indices = @transform_1, window_bounds = array<i64: 288, 128>}, {pipeline_mode = #tpu.pipeline_mode<synchronous>, transform_indices = @transform_2, window_bounds = array<i64: 128, 128>}, {pipeline_mode = #tpu.pipeline_mode<synchronous>, transform_indices = @transform_3, window_bounds = array<i64: 1, 128>}, {pipeline_mode = #tpu.pipeline_mode<synchronous>, transform_indices = @transform_4, window_bounds = array<i64: 1, 128>}, {pipeline_mode = #tpu.pipeline_mode<synchronous>, transform_indices = @transform_5, window_bounds = array<i64: 1, 128>}, {transform_indices = @transform_6, window_bounds = array<i64: 1, 4, 8, 128>}]} {
    %c0_i32 = arith.constant 0 : i32
    %0 = arith.cmpi eq, %arg1, %c0_i32 : i32
    %1 = arith.extui %0 : i1 to i32
    %c0_i32_0 = arith.constant 0 : i32
    %2 = arith.cmpi ne, %1, %c0_i32_0 : i32
    scf.if %2 {
      %cst_45 = arith.constant 0.000000e+00 : f32
      %73 = vector.broadcast %cst_45 : f32 to vector<10x10x32xf32>
      %c0_46 = arith.constant 0 : index
      %c0_47 = arith.constant 0 : index
      %c0_48 = arith.constant 0 : index
      %74 = vector.load %arg9[%c0_46, %c0_47, %c0_48] : memref<10x10x32xf32, #tpu.memory_space<vmem>>, vector<10x10x32xf32>
      tpu.vector_store %arg9[%c0_46, %c0_47, %c0_48], %73 {strides = array<i32>} : memref<10x10x32xf32, #tpu.memory_space<vmem>>, vector<10x10x32xf32>,
      %c0_49 = arith.constant 0 : index
      %c0_50 = arith.constant 0 : index
      %c0_51 = arith.constant 0 : index
      %c0_52 = arith.constant 0 : index
      %75 = vector.load %arg2[%c0_49, %c0_50, %c0_51, %c0_52] : memref<1x8x8x32xbf16, #tpu.memory_space<vmem>>, vector<1x1x8x32xbf16>
      %76 = vector.shape_cast %75 : vector<1x1x8x32xbf16> to vector<8x32xbf16>
      %77 = arith.extf %76 : vector<8x32xbf16> to vector<8x32xf32>
      %c1_53 = arith.constant 1 : index
      %c1_54 = arith.constant 1 : index
      %c0_55 = arith.constant 0 : index
      %78 = vector.load %arg9[%c1_53, %c1_54, %c0_55] : memref<10x10x32xf32, #tpu.memory_space<vmem>>, vector<1x8x32xf32>
      %79 = vector.shape_cast %78 : vector<1x8x32xf32> to vector<8x32xf32>
      %80 = vector.shape_cast %77 : vector<8x32xf32> to vector<1x8x32xf32>
      tpu.vector_store %arg9[%c1_53, %c1_54, %c0_55], %80 {strides = array<i32>} : memref<10x10x32xf32, #tpu.memory_space<vmem>>, vector<1x8x32xf32>,
      %c0_56 = arith.constant 0 : index
      %c1_57 = arith.constant 1 : index
      %c0_58 = arith.constant 0 : index
      %c0_59 = arith.constant 0 : index
      %81 = vector.load %arg2[%c0_56, %c1_57, %c0_58, %c0_59] : memref<1x8x8x32xbf16, #tpu.memory_space<vmem>>, vector<1x1x8x32xbf16>
      %82 = vector.shape_cast %81 : vector<1x1x8x32xbf16> to vector<8x32xbf16>
      %83 = arith.extf %82 : vector<8x32xbf16> to vector<8x32xf32>
      %c2_60 = arith.constant 2 : index
      %c1_61 = arith.constant 1 : index
      %c0_62 = arith.constant 0 : index
      %84 = vector.load %arg9[%c2_60, %c1_61, %c0_62] : memref<10x10x32xf32, #tpu.memory_space<vmem>>, vector<1x8x32xf32>
      %85 = vector.shape_cast %84 : vector<1x8x32xf32> to vector<8x32xf32>
      %86 = vector.shape_cast %83 : vector<8x32xf32> to vector<1x8x32xf32>
      tpu.vector_store %arg9[%c2_60, %c1_61, %c0_62], %86 {strides = array<i32>} : memref<10x10x32xf32, #tpu.memory_space<vmem>>, vector<1x8x32xf32>,
      %c0_63 = arith.constant 0 : index
      %c2_64 = arith.constant 2 : index
      %c0_65 = arith.constant 0 : index
      %c0_66 = arith.constant 0 : index
      %87 = vector.load %arg2[%c0_63, %c2_64, %c0_65, %c0_66] : memref<1x8x8x32xbf16, #tpu.memory_space<vmem>>, vector<1x1x8x32xbf16>
      %88 = vector.shape_cast %87 : vector<1x1x8x32xbf16> to vector<8x32xbf16>
      %89 = arith.extf %88 : vector<8x32xbf16> to vector<8x32xf32>
      %c3 = arith.constant 3 : index
      %c1_67 = arith.constant 1 : index
      %c0_68 = arith.constant 0 : index
      %90 = vector.load %arg9[%c3, %c1_67, %c0_68] : memref<10x10x32xf32, #tpu.memory_space<vmem>>, vector<1x8x32xf32>
      %91 = vector.shape_cast %90 : vector<1x8x32xf32> to vector<8x32xf32>
      %92 = vector.shape_cast %89 : vector<8x32xf32> to vector<1x8x32xf32>
      tpu.vector_store %arg9[%c3, %c1_67, %c0_68], %92 {strides = array<i32>} : memref<10x10x32xf32, #tpu.memory_space<vmem>>, vector<1x8x32xf32>,
      %c0_69 = arith.constant 0 : index
      %c3_70 = arith.constant 3 : index
      %c0_71 = arith.constant 0 : index
      %c0_72 = arith.constant 0 : index
      %93 = vector.load %arg2[%c0_69, %c3_70, %c0_71, %c0_72] : memref<1x8x8x32xbf16, #tpu.memory_space<vmem>>, vector<1x1x8x32xbf16>
      %94 = vector.shape_cast %93 : vector<1x1x8x32xbf16> to vector<8x32xbf16>
      %95 = arith.extf %94 : vector<8x32xbf16> to vector<8x32xf32>
      %c4 = arith.constant 4 : index
      %c1_73 = arith.constant 1 : index
      %c0_74 = arith.constant 0 : index
      %96 = vector.load %arg9[%c4, %c1_73, %c0_74] : memref<10x10x32xf32, #tpu.memory_space<vmem>>, vector<1x8x32xf32>
      %97 = vector.shape_cast %96 : vector<1x8x32xf32> to vector<8x32xf32>
      %98 = vector.shape_cast %95 : vector<8x32xf32> to vector<1x8x32xf32>
      tpu.vector_store %arg9[%c4, %c1_73, %c0_74], %98 {strides = array<i32>} : memref<10x10x32xf32, #tpu.memory_space<vmem>>, vector<1x8x32xf32>,
      %c0_75 = arith.constant 0 : index
      %c4_76 = arith.constant 4 : index
      %c0_77 = arith.constant 0 : index
      %c0_78 = arith.constant 0 : index
      %99 = vector.load %arg2[%c0_75, %c4_76, %c0_77, %c0_78] : memref<1x8x8x32xbf16, #tpu.memory_space<vmem>>, vector<1x1x8x32xbf16>
      %100 = vector.shape_cast %99 : vector<1x1x8x32xbf16> to vector<8x32xbf16>
      %101 = arith.extf %100 : vector<8x32xbf16> to vector<8x32xf32>
      %c5 = arith.constant 5 : index
      %c1_79 = arith.constant 1 : index
      %c0_80 = arith.constant 0 : index
      %102 = vector.load %arg9[%c5, %c1_79, %c0_80] : memref<10x10x32xf32, #tpu.memory_space<vmem>>, vector<1x8x32xf32>
      %103 = vector.shape_cast %102 : vector<1x8x32xf32> to vector<8x32xf32>
      %104 = vector.shape_cast %101 : vector<8x32xf32> to vector<1x8x32xf32>
      tpu.vector_store %arg9[%c5, %c1_79, %c0_80], %104 {strides = array<i32>} : memref<10x10x32xf32, #tpu.memory_space<vmem>>, vector<1x8x32xf32>,
      %c0_81 = arith.constant 0 : index
      %c5_82 = arith.constant 5 : index
      %c0_83 = arith.constant 0 : index
      %c0_84 = arith.constant 0 : index
      %105 = vector.load %arg2[%c0_81, %c5_82, %c0_83, %c0_84] : memref<1x8x8x32xbf16, #tpu.memory_space<vmem>>, vector<1x1x8x32xbf16>
      %106 = vector.shape_cast %105 : vector<1x1x8x32xbf16> to vector<8x32xbf16>
      %107 = arith.extf %106 : vector<8x32xbf16> to vector<8x32xf32>
      %c6 = arith.constant 6 : index
      %c1_85 = arith.constant 1 : index
      %c0_86 = arith.constant 0 : index
      %108 = vector.load %arg9[%c6, %c1_85, %c0_86] : memref<10x10x32xf32, #tpu.memory_space<vmem>>, vector<1x8x32xf32>
      %109 = vector.shape_cast %108 : vector<1x8x32xf32> to vector<8x32xf32>
      %110 = vector.shape_cast %107 : vector<8x32xf32> to vector<1x8x32xf32>
      tpu.vector_store %arg9[%c6, %c1_85, %c0_86], %110 {strides = array<i32>} : memref<10x10x32xf32, #tpu.memory_space<vmem>>, vector<1x8x32xf32>,
      %c0_87 = arith.constant 0 : index
      %c6_88 = arith.constant 6 : index
      %c0_89 = arith.constant 0 : index
      %c0_90 = arith.constant 0 : index
      %111 = vector.load %arg2[%c0_87, %c6_88, %c0_89, %c0_90] : memref<1x8x8x32xbf16, #tpu.memory_space<vmem>>, vector<1x1x8x32xbf16>
      %112 = vector.shape_cast %111 : vector<1x1x8x32xbf16> to vector<8x32xbf16>
      %113 = arith.extf %112 : vector<8x32xbf16> to vector<8x32xf32>
      %c7 = arith.constant 7 : index
      %c1_91 = arith.constant 1 : index
      %c0_92 = arith.constant 0 : index
      %114 = vector.load %arg9[%c7, %c1_91, %c0_92] : memref<10x10x32xf32, #tpu.memory_space<vmem>>, vector<1x8x32xf32>
      %115 = vector.shape_cast %114 : vector<1x8x32xf32> to vector<8x32xf32>
      %116 = vector.shape_cast %113 : vector<8x32xf32> to vector<1x8x32xf32>
      tpu.vector_store %arg9[%c7, %c1_91, %c0_92], %116 {strides = array<i32>} : memref<10x10x32xf32, #tpu.memory_space<vmem>>, vector<1x8x32xf32>,
      %c0_93 = arith.constant 0 : index
      %c7_94 = arith.constant 7 : index
      %c0_95 = arith.constant 0 : index
      %c0_96 = arith.constant 0 : index
      %117 = vector.load %arg2[%c0_93, %c7_94, %c0_95, %c0_96] : memref<1x8x8x32xbf16, #tpu.memory_space<vmem>>, vector<1x1x8x32xbf16>
      %118 = vector.shape_cast %117 : vector<1x1x8x32xbf16> to vector<8x32xbf16>
      %119 = arith.extf %118 : vector<8x32xbf16> to vector<8x32xf32>
      %c8 = arith.constant 8 : index
      %c1_97 = arith.constant 1 : index
      %c0_98 = arith.constant 0 : index
      %120 = vector.load %arg9[%c8, %c1_97, %c0_98] : memref<10x10x32xf32, #tpu.memory_space<vmem>>, vector<1x8x32xf32>
      %121 = vector.shape_cast %120 : vector<1x8x32xf32> to vector<8x32xf32>
      %122 = vector.shape_cast %119 : vector<8x32xf32> to vector<1x8x32xf32>
      tpu.vector_store %arg9[%c8, %c1_97, %c0_98], %122 {strides = array<i32>} : memref<10x10x32xf32, #tpu.memory_space<vmem>>, vector<1x8x32xf32>,
    } else {
    }
    %c4_i32 = arith.constant 4 : i32
    %3 = arith.muli %arg1, %c4_i32 : i32
    %c1_i32 = arith.constant 1 : i32
    %4 = arith.muli %3, %c1_i32 : i32
    %c0_i32_1 = arith.constant 0 : i32
    %5 = arith.addi %4, %c0_i32_1 : i32
    %6 = arith.index_cast %5 : i32 to index
    %c0 = arith.constant 0 : index
    %c0_2 = arith.constant 0 : index
    %7 = vector.load %arg9[%6, %c0, %c0_2] : memref<10x10x32xf32, #tpu.memory_space<vmem>>, vector<4x8x32xf32>
    %8 = vector.shape_cast %7 : vector<4x8x32xf32> to vector<32x32xf32>
    %c0_i32_3 = arith.constant 0 : i32
    %9 = arith.addi %4, %c0_i32_3 : i32
    %10 = arith.index_cast %9 : i32 to index
    %c1 = arith.constant 1 : index
    %c0_4 = arith.constant 0 : index
    %11 = vector.load %arg9[%10, %c1, %c0_4] : memref<10x10x32xf32, #tpu.memory_space<vmem>>, vector<4x8x32xf32>
    %12 = vector.shape_cast %11 : vector<4x8x32xf32> to vector<32x32xf32>
    %c0_i32_5 = arith.constant 0 : i32
    %13 = arith.addi %4, %c0_i32_5 : i32
    %14 = arith.index_cast %13 : i32 to index
    %c2 = arith.constant 2 : index
    %c0_6 = arith.constant 0 : index
    %15 = vector.load %arg9[%14, %c2, %c0_6] : memref<10x10x32xf32, #tpu.memory_space<vmem>>, vector<4x8x32xf32>
    %16 = vector.shape_cast %15 : vector<4x8x32xf32> to vector<32x32xf32>
    %c1_i32_7 = arith.constant 1 : i32
    %17 = arith.addi %4, %c1_i32_7 : i32
    %18 = arith.index_cast %17 : i32 to index
    %c0_8 = arith.constant 0 : index
    %c0_9 = arith.constant 0 : index
    %19 = vector.load %arg9[%18, %c0_8, %c0_9] : memref<10x10x32xf32, #tpu.memory_space<vmem>>, vector<4x8x32xf32>
    %20 = vector.shape_cast %19 : vector<4x8x32xf32> to vector<32x32xf32>
    %c1_i32_10 = arith.constant 1 : i32
    %21 = arith.addi %4, %c1_i32_10 : i32
    %22 = arith.index_cast %21 : i32 to index
    %c1_11 = arith.constant 1 : index
    %c0_12 = arith.constant 0 : index
    %23 = vector.load %arg9[%22, %c1_11, %c0_12] : memref<10x10x32xf32, #tpu.memory_space<vmem>>, vector<4x8x32xf32>
    %24 = vector.shape_cast %23 : vector<4x8x32xf32> to vector<32x32xf32>
    %c1_i32_13 = arith.constant 1 : i32
    %25 = arith.addi %4, %c1_i32_13 : i32
    %26 = arith.index_cast %25 : i32 to index
    %c2_14 = arith.constant 2 : index
    %c0_15 = arith.constant 0 : index
    %27 = vector.load %arg9[%26, %c2_14, %c0_15] : memref<10x10x32xf32, #tpu.memory_space<vmem>>, vector<4x8x32xf32>
    %28 = vector.shape_cast %27 : vector<4x8x32xf32> to vector<32x32xf32>
    %c2_i32 = arith.constant 2 : i32
    %29 = arith.addi %4, %c2_i32 : i32
    %30 = arith.index_cast %29 : i32 to index
    %c0_16 = arith.constant 0 : index
    %c0_17 = arith.constant 0 : index
    %31 = vector.load %arg9[%30, %c0_16, %c0_17] : memref<10x10x32xf32, #tpu.memory_space<vmem>>, vector<4x8x32xf32>
    %32 = vector.shape_cast %31 : vector<4x8x32xf32> to vector<32x32xf32>
    %c2_i32_18 = arith.constant 2 : i32
    %33 = arith.addi %4, %c2_i32_18 : i32
    %34 = arith.index_cast %33 : i32 to index
    %c1_19 = arith.constant 1 : index
    %c0_20 = arith.constant 0 : index
    %35 = vector.load %arg9[%34, %c1_19, %c0_20] : memref<10x10x32xf32, #tpu.memory_space<vmem>>, vector<4x8x32xf32>
    %36 = vector.shape_cast %35 : vector<4x8x32xf32> to vector<32x32xf32>
    %c2_i32_21 = arith.constant 2 : i32
    %37 = arith.addi %4, %c2_i32_21 : i32
    %38 = arith.index_cast %37 : i32 to index
    %c2_22 = arith.constant 2 : index
    %c0_23 = arith.constant 0 : index
    %39 = vector.load %arg9[%38, %c2_22, %c0_23] : memref<10x10x32xf32, #tpu.memory_space<vmem>>, vector<4x8x32xf32>
    %40 = vector.shape_cast %39 : vector<4x8x32xf32> to vector<32x32xf32>
    %41 = tpu.concatenate %8, %12, %16, %20, %24, %28, %32, %36, %40 in 1 : vector<32x32xf32>, vector<32x32xf32>, vector<32x32xf32>, vector<32x32xf32>, vector<32x32xf32>, vector<32x32xf32>, vector<32x32xf32>, vector<32x32xf32>, vector<32x32xf32> -> vector<32x288xf32>
    %42 = arith.truncf %41 : vector<32x288xf32> to vector<32x288xbf16>
    %c0_24 = arith.constant 0 : index
    %c0_25 = arith.constant 0 : index
    %43 = vector.load %arg3[%c0_24, %c0_25] : memref<288x128xbf16, #tpu.memory_space<vmem>>, vector<288x128xbf16>
    %cst = arith.constant dense<0.000000e+00> : vector<32x128xf32>
    %44 = tpu.matmul %42, %43, %cst {dimension_numbers = #tpu.dot_dimension_numbers<[1], [0], [0], [1], [0, 0, 1, 1], [], []>} : vector<32x288xbf16>, vector<288x128xbf16>, vector<32x128xf32> -> vector<32x128xf32>
    %c0_26 = arith.constant 0 : index
    %c0_27 = arith.constant 0 : index
    %45 = vector.load %arg5[%c0_26, %c0_27] : memref<1x128xf32, #tpu.memory_space<vmem>>, vector<1x128xf32>
    %46 = vector.broadcast %45 : vector<1x128xf32> to vector<32x128xf32>
    %47 = arith.addf %44, %46 : vector<32x128xf32>
    %c0_28 = arith.constant 0 : index
    %c0_29 = arith.constant 0 : index
    %48 = vector.load %arg4[%c0_28, %c0_29] : memref<128x128xf32, #tpu.memory_space<vmem>>, vector<128x128xf32>
    %cst_30 = arith.constant dense<0.000000e+00> : vector<32x128xf32>
    %49 = tpu.matmul %47, %48, %cst_30 {dimension_numbers = #tpu.dot_dimension_numbers<[1], [0], [0], [1], [0, 0, 1, 1], [], []>} : vector<32x128xf32>, vector<128x128xf32>, vector<32x128xf32> -> vector<32x128xf32>
    %50 = arith.subf %47, %49 : vector<32x128xf32>
    %51 = arith.mulf %50, %50 : vector<32x128xf32>
    %c0_31 = arith.constant 0 : index
    %c0_32 = arith.constant 0 : index
    %52 = vector.load %arg4[%c0_31, %c0_32] : memref<128x128xf32, #tpu.memory_space<vmem>>, vector<128x128xf32>
    %cst_33 = arith.constant dense<0.000000e+00> : vector<32x128xf32>
    %53 = tpu.matmul %51, %52, %cst_33 {dimension_numbers = #tpu.dot_dimension_numbers<[1], [0], [0], [1], [0, 0, 1, 1], [], []>} : vector<32x128xf32>, vector<128x128xf32>, vector<32x128xf32> -> vector<32x128xf32>
    %cst_34 = arith.constant 9.99999974E-6 : f32
    %54 = vector.broadcast %cst_34 : f32 to vector<32x128xf32>
    %55 = arith.addf %53, %54 : vector<32x128xf32>
    %56 = math.rsqrt %55 : vector<32x128xf32>
    %57 = arith.mulf %50, %56 : vector<32x128xf32>
    %c0_35 = arith.constant 0 : index
    %c0_36 = arith.constant 0 : index
    %58 = vector.load %arg6[%c0_35, %c0_36] : memref<1x128xf32, #tpu.memory_space<vmem>>, vector<1x128xf32>
    %59 = vector.broadcast %58 : vector<1x128xf32> to vector<32x128xf32>
    %60 = arith.mulf %57, %59 : vector<32x128xf32>
    %c0_37 = arith.constant 0 : index
    %c0_38 = arith.constant 0 : index
    %61 = vector.load %arg7[%c0_37, %c0_38] : memref<1x128xf32, #tpu.memory_space<vmem>>, vector<1x128xf32>
    %62 = vector.broadcast %61 : vector<1x128xf32> to vector<32x128xf32>
    %63 = arith.addf %60, %62 : vector<32x128xf32>
    %cst_39 = arith.constant 0.000000e+00 : f32
    %64 = vector.broadcast %cst_39 : f32 to vector<32x128xf32>
    %65 = arith.cmpf oge, %63, %64 : vector<32x128xf32>
    %cst_40 = arith.constant 2.000000e-01 : f32
    %66 = vector.broadcast %cst_40 : f32 to vector<32x128xf32>
    %67 = arith.mulf %66, %63 : vector<32x128xf32>
    %68 = arith.select %65, %63, %67 : vector<32x128xi1>, vector<32x128xf32>
    %69 = vector.shape_cast %68 : vector<32x128xf32> to vector<4x8x128xf32>
    %c0_41 = arith.constant 0 : index
    %c0_42 = arith.constant 0 : index
    %c0_43 = arith.constant 0 : index
    %c0_44 = arith.constant 0 : index
    %70 = vector.load %arg8[%c0_41, %c0_42, %c0_43, %c0_44] : memref<1x4x8x128xf32, #tpu.memory_space<vmem>>, vector<1x4x8x128xf32>
    %71 = vector.shape_cast %70 : vector<1x4x8x128xf32> to vector<4x8x128xf32>
    %72 = vector.shape_cast %69 : vector<4x8x128xf32> to vector<1x4x8x128xf32>
    tpu.vector_store %arg8[%c0_41, %c0_42, %c0_43, %c0_44], %72 {strides = array<i32>} : memref<1x4x8x128xf32, #tpu.memory_space<vmem>>, vector<1x4x8x128xf32>,
    return
  }
  func.func @transform_0(%arg0: i32, %arg1: i32) -> (i32, i32, i32, i32) {
    %c0_i32 = arith.constant 0 : i32
    %c0_i32_0 = arith.constant 0 : i32
    %c0_i32_1 = arith.constant 0 : i32
    %c0_i32_2 = arith.constant 0 : i32
    return %arg0, %c0_i32, %c0_i32_0, %c0_i32_1 : i32, i32, i32, i32
  }
  func.func @transform_1(%arg0: i32, %arg1: i32) -> (i32, i32) {
    %c0_i32 = arith.constant 0 : i32
    %c0_i32_0 = arith.constant 0 : i32
    %c0_i32_1 = arith.constant 0 : i32
    return %c0_i32, %c0_i32_0 : i32, i32
  }
  func.func @transform_2(%arg0: i32, %arg1: i32) -> (i32, i32) {
    %c0_i32 = arith.constant 0 : i32
    %c0_i32_0 = arith.constant 0 : i32
    %c0_i32_1 = arith.constant 0 : i32
    return %c0_i32, %c0_i32_0 : i32, i32
  }
  func.func @transform_3(%arg0: i32, %arg1: i32) -> (i32, i32) {
    %c0_i32 = arith.constant 0 : i32
    %c0_i32_0 = arith.constant 0 : i32
    %c0_i32_1 = arith.constant 0 : i32
    return %c0_i32, %c0_i32_0 : i32, i32
  }
  func.func @transform_4(%arg0: i32, %arg1: i32) -> (i32, i32) {
    %c0_i32 = arith.constant 0 : i32
    %c0_i32_0 = arith.constant 0 : i32
    %c0_i32_1 = arith.constant 0 : i32
    return %c0_i32, %c0_i32_0 : i32, i32
  }
  func.func @transform_5(%arg0: i32, %arg1: i32) -> (i32, i32) {
    %c0_i32 = arith.constant 0 : i32
    %c0_i32_0 = arith.constant 0 : i32
    %c0_i32_1 = arith.constant 0 : i32
    return %c0_i32, %c0_i32_0 : i32, i32
  }
  func.func @transform_6(%arg0: i32, %arg1: i32) -> (i32, i32, i32, i32) {
    %c0_i32 = arith.constant 0 : i32
    %c0_i32_0 = arith.constant 0 : i32
    %c0_i32_1 = arith.constant 0 : i32
    return %arg0, %arg1, %c0_i32, %c0_i32_0 : i32, i32, i32, i32
  }
}

</mosaic_0001>

<bundles_post_ra>
// kernel: tile.18
= control target key start
LH: loop header
LB: loop body
LE: loop exit
PB: predicated region body
PF: predicated region fallthrough
CT: control target
= control target key end

     0   :  { %s22_s0 = inlined_call_operand.vmem [shape: f32[16], index: 0, kind: input, shape index: {}]   ;;  %s23_s1 = inlined_call_operand.vmem [shape: f32[8,16], index: 1, kind: output, shape index: {}]  }
   0x1   :  { %v4_v0 = vld [vmem:[%s22_s0] ss:$0 sm:$0xff] }
   0x2   :  { %5 = vst [vmem:[%s23_s1] sm:$0xff] %v4_v0 }

// kernel: lr_conv_block_3d.1
= control target key start
LH: loop header
LB: loop body
LE: loop exit
PB: predicated region body
PF: predicated region fallthrough
CT: control target
= control target key end

     0   :  { %s1629_s21 = smov 0   ;;  %s1631_s22 = smov 0   ;;  %s1964_s0 = inlined_call_operand.vmem [shape: bf16[2,8,8,32], index: 0, kind: input, shape index: {}]   ;;  %s1965_s1 = inlined_call_operand.vmem [shape: bf16[288,128], index: 1, kind: input, shape index: {}]   ;;  %s1966_s2 = inlined_call_operand.vmem [shape: f32[128,128], index: 2, kind: input, shape index: {}]   ;;  %s1967_s3 = inlined_call_operand.vmem [shape: f32[1,128], index: 3, kind: input, shape index: {}]   ;;  %s1968_s4 = inlined_call_operand.vmem [shape: f32[1,128], index: 4, kind: input, shape index: {}]   ;;  %s1969_s5 = inlined_call_operand.vmem [shape: f32[1,128], index: 5, kind: input, shape index: {}]   ;;  %s1970_s6 = inlined_call_operand.vmem [shape: f32[2,8,8,128], index: 6, kind: output, shape index: {}]  }
   0x1   :  { %s1633_s23 = smov 0   ;;  %s1635_s24 = smov 0  }
   0x2   :  { %s1637_s25 = smov 0  }
   0x3 LB: > { %s25_s26 = sadd.s32 1, %s1580_s23  ;;  %s28_s27 = sadd.s32 1, %s1584_s24  ;;  %s1588_s25 = sphi %s1637_s25, %s16_s25   ;;  %s1584_s24 = sphi %s1635_s24, %s1974_s24   ;;  %s1580_s23 = sphi %s1633_s23, %s1973_s23   ;;  %s1576_s22 = sphi %s1631_s22, %s1972_s22   ;;  %s1572_s21 = sphi %s1629_s21, %s1971_s21  }
   0x4   : > { %p26_p0 = scmp.ge.s32.totalorder %s25_s26, 2  ;;  %p1108_p1 = scmp.ge.s32.totalorder %s1588_s25, 1 }
   0x5   : > { %p226_p2 = scmp.lt.s32.totalorder %s1588_s25, 5 }
   0x6   : > { %s1976_s26 = smov (%p26_p0, %s25_s26), 0  ;;  %s1978_s27 = smov (!%p26_p0, %s28_s27), %s1584_s24 }
   0x7   : > { %p227_p3 = pnand %p1108_p1, %p226_p2  ;;  %p30_p4 = scmp.ge.s32.totalorder %s1978_s27, 2 }
   0x8   : > { %p260_p5 = scmp.lt.s32.totalorder (!%p227_p3), %s1576_s22, 1  ;;  %s1111_s28 = sshll.u32 (!%p227_p3), %s1572_s21, 2 }
   0x9   : > { %s1980_s27 = smov (%p30_p4, %s1978_s27), 0  ;;  %230 = sbr.rel (%p227_p3) target bundleno = 859 (0x35b), region = 44 }
   0xa   : > { %p268_p6 = scmp.lt.s32.totalorder (!%p227_p3), %s1111_s28, 7  ;;  %p1114_p7 = scmp.ne.s32.totalorder (!%p227_p3), %s1572_s21, 0 }
  0x10   : > { %s1982_s22 = smov (!%p260_p5, %s1576_s22), 1  ;;  %s1984_s28 = smov (!%p268_p6, %s1111_s28), 7 }
  0x11   : > { %s1177_s29 = sshll.u32 %s1982_s22, 5  ;;  %s1112_s30 = sshll.u32 %s1982_s22, 3  ;;  %vm280_vm0 = vcmask (!%p1114_p7), 261120   ;;  %vm282_vm1 = vcmask (!%p1114_p7), 254976   ;;  %v1590_v3 = vmov (!%p1114_p7), 0.0  }
  0x12   : > { %s1665_s9 = scalar_lea.vmem %s1964_s0, %s1177_s29  ;;  %s271_s10 = sadd.s32 %s1112_s30, %s1984_s28  ;;  %284 = vst.msk [vmem:[#allocation2 + $0x10] sm:$0xff] (!%p1114_p7), %vm280_vm0, %v1590_v3  ;;  %281 = vst.msk [vmem:[#allocation2] sm:$0xff] (!%p1114_p7), %vm280_vm0, %v1590_v3 }
  0x13   : > { %s1113_s11 = sshll.u32 %s271_s10, 3  ;;  %279 = sbr.rel (%p1114_p7) target bundleno = 33 (0x21), region = 48  ;;  %v1182_v0 = vld [vmem:[%s1665_s9] sm:$0xff] (!%p1114_p7)   ;;  %v1197_v1 = vld [vmem:[%s1665_s9 + $0x8] sm:$0xff] (!%p1114_p7)   ;;  %v1198_v2 = vld [vmem:[%s1665_s9 + $0x10] sm:$0xff] (!%p1114_p7)   ;;  %286 = vst.msk [vmem:[#allocation2 + $0x20] sm:$0xff] (!%p1114_p7), %vm280_vm0, %v1590_v3 }
  0x14   : > { %s1670_s14 = scalar_lea.vmem %s1970_s6, %s1113_s11  ;;  %288 = vst.msk [vmem:[#allocation2 + $0x30] sm:$0xff] (!%p1114_p7), %vm280_vm0, %v1590_v3  ;;  %290 = vst.msk [vmem:[#allocation2 + $0x40] sm:$0xff] (!%p1114_p7), %vm280_vm0, %v1590_v3  ;;  %v1183_v4 = vunpack.c.l.bf16 (!%p1114_p7), %v1182_v0  ;;  %v1184_v5 = vunpack.c.h.bf16 (!%p1114_p7), %v1182_v0  ;;  %v1187_v6 = vunpack.c.l.bf16 (!%p1114_p7), %v1197_v1  ;;  %v1188_v7 = vunpack.c.h.bf16 (!%p1114_p7), %v1197_v1  ;;  %v1199_v8 = vld [vmem:[%s1665_s9 + $0x18] sm:$0xff] (!%p1114_p7)  }
  0x15   : > { %292 = vst.msk [vmem:[#allocation2 + $0x50] sm:$0xff] (!%p1114_p7), %vm280_vm0, %v1590_v3  ;;  %294 = vst.msk [vmem:[#allocation2 + $0x60] sm:$0xff] (!%p1114_p7), %vm280_vm0, %v1590_v3  ;;  %v1191_v9 = vunpack.c.l.bf16 (!%p1114_p7), %v1198_v2  ;;  %v1192_v10 = vunpack.c.h.bf16 (!%p1114_p7), %v1198_v2  ;;  %v1195_v11 = vunpack.c.l.bf16 (!%p1114_p7), %v1199_v8  ;;  %v1196_v12 = vunpack.c.h.bf16 (!%p1114_p7), %v1199_v8 }
  0x16   : > { %296 = vst.msk [vmem:[#allocation2 + $0x70] sm:$0xff] (!%p1114_p7), %vm280_vm0, %v1590_v3  ;;  %298 = vst.msk [vmem:[#allocation2 + $0x80] sm:$0xff] (!%p1114_p7), %vm280_vm0, %v1590_v3 }
  0x17   : > { %300 = vst.msk [vmem:[#allocation2 + $0x90] sm:$0xff] (!%p1114_p7), %vm280_vm0, %v1590_v3 }
  0x18   : > { %285 = vst.msk [vmem:[#allocation2 + $0x18] sm:$0x3] (!%p1114_p7), %vm282_vm1, %v1590_v3  ;;  %283 = vst.msk [vmem:[#allocation2 + $0x8] sm:$0x3] (!%p1114_p7), %vm282_vm1, %v1590_v3 }
  0x19   : > { %287 = vst.msk [vmem:[#allocation2 + $0x28] sm:$0x3] (!%p1114_p7), %vm282_vm1, %v1590_v3  ;;  %289 = vst.msk [vmem:[#allocation2 + $0x38] sm:$0x3] (!%p1114_p7), %vm282_vm1, %v1590_v3 }
  0x1a   : > { %291 = vst.msk [vmem:[#allocation2 + $0x48] sm:$0x3] %vm282_vm1, %v1590_v3  ;;  %293 = vst.msk [vmem:[#allocation2 + $0x58] sm:$0x3] %vm282_vm1, %v1590_v3 }
  0x1b   : > { %295 = vst.msk [vmem:[#allocation2 + $0x68] sm:$0x3] %vm282_vm1, %v1590_v3  ;;  %297 = vst.msk [vmem:[#allocation2 + $0x78] sm:$0x3] %vm282_vm1, %v1590_v3 }
  0x1c   : > { %299 = vst.msk [vmem:[#allocation2 + $0x88] sm:$0x3] %vm282_vm1, %v1590_v3  ;;  %301 = vst.msk [vmem:[#allocation2 + $0x98] sm:$0x3] %vm282_vm1, %v1590_v3 }
  0x1d   : > { %305 = vst.msk [vmem:[#allocation2 + $0x11] sm:$0xff] %vm280_vm0, %v1183_v4  ;;  %310 = vst.msk [vmem:[#allocation2 + $0x21] sm:$0xff] %vm280_vm0, %v1184_v5 }
  0x1e   : > { %315 = vst.msk [vmem:[#allocation2 + $0x31] sm:$0xff] %vm280_vm0, %v1187_v6  ;;  %320 = vst.msk [vmem:[#allocation2 + $0x41] sm:$0xff] %vm280_vm0, %v1188_v7 }
  0x1f   : > { %325 = vst.msk [vmem:[#allocation2 + $0x51] sm:$0xff] %vm280_vm0, %v1191_v9  ;;  %330 = vst.msk [vmem:[#allocation2 + $0x61] sm:$0xff] %vm280_vm0, %v1192_v10 }
  0x20   : > { %335 = vst.msk [vmem:[#allocation2 + $0x71] sm:$0xff] %vm280_vm0, %v1195_v11  ;;  %340 = vst.msk [vmem:[#allocation2 + $0x81] sm:$0xff] %vm280_vm0, %v1196_v12 }
  0x21 PF: > { %s1178_s15 = sshll.u32 %s1572_s21, 6  ;;  %v1524_v13 = vld [vmem:[%s1965_s1 + $0x40] sm:$0xff]   ;;  %s1591_s21 = smov 64   ;;  %v1526_v30 = vld [vmem:[%s1965_s1 + $0x48] sm:$0xff]   ;;  %v1528_v36 = vld [vmem:[%s1965_s1 + $0x50] sm:$0xff]   ;;  %vm482_vm2 = vcmask 261120  }
  0x22   : > { %v1525_v14 = vld [vmem:[%s1965_s1] sm:$0xff]   ;;  %s1712_s20 = scalar_lea.vmem [#allocation2], %s1178_s15  ;;  %1200 = vmatprep.subr.bf16.mxu0 %v1524_v13  ;;  %s1592_s22 = smov 32   ;;  %v1527_v34 = vld [vmem:[%s1965_s1 + $0x8] sm:$0xff]   ;;  %v1529_v37 = vld [vmem:[%s1965_s1 + $0x10] sm:$0xff]   ;;  %vm487_vm3 = vcmask 523264  }
  0x23   : > { %1201 = vmatpush3.bf16.msra.mxu0 %v1525_v14  ;;  %v1530_v38 = vld [vmem:[%s1965_s1 + $0x58] sm:$0xff]   ;;  %s1593_s15 = smov 96   ;;  %v1532_v43 = vld [vmem:[%s1965_s1 + $0x60] sm:$0xff]   ;;  %v1534_v49 = vld [vmem:[%s1965_s1 + $0x68] sm:$0xff]   ;;  %vm492_vm4 = vcmask 785408  }
  0x24   : > { %1202 = vmatprep.subr.bf16.mxu0 %v1526_v30  ;;  %v1531_v42 = vld [vmem:[%s1965_s1 + $0x18] sm:$0xff]   ;;  %v1533_v48 = vld [vmem:[%s1965_s1 + $0x20] sm:$0xff]   ;;  %v1535_v51 = vld [vmem:[%s1965_s1 + $0x28] sm:$0xff]  }
  0x25   : > { %v1539_v52 = vld [vmem:[%s1965_s1 + $0x80] sm:$0xff]   ;;  %v1536_v54 = vld [vmem:[%s1965_s1 + $0x70] sm:$0xff]   ;;  %v1541_v55 = vld [vmem:[%s1965_s1 + $0x88] sm:$0xff]  }
  0x26   : > { %1272 = vmatprep.subr.bf16.mxu1 %v1539_v52  ;;  %v770_v57 = vld [vmem:[%s1966_s2] sm:$0xff]  ;;  %v771_v58 = vld [vmem:[%s1966_s2 + $0x8] sm:$0xff]  ;;  %v772_v60 = vld [vmem:[%s1966_s2 + $0x10] sm:$0xff] }
  0x27   : > { %v1715_v15 = vld [vmem:[%s1712_s20 + $0x20] sm:$0xff]  ;;  %v1718_v16 = vld [vmem:[%s1712_s20 + $0x30] sm:$0xff]  ;;  %1203 = vmatpush3.bf16.msra.mxu0 %v1527_v34  ;;  %1273 = vmatpush3.bf16.msra.mxu1 %v1539_v52  ;;  %v1814_v59 = vpack.c.bf16 %v771_v58, %v770_v57  ;;  %v773_v61 = vld [vmem:[%s1966_s2 + $0x18] sm:$0xff] }
  0x28   : > { %v1134_v17 = vld [vmem:[%s1712_s20 + $0x12] sm:$0xff]  ;;  %v1474_v18 = vpack.i.bf16 %v1718_v16, %v1715_v15  ;;  %v1135_v19 = vld [vmem:[%s1712_s20 + $0x22] sm:$0xff]  ;;  %1204 = vmatprep.subr.bf16.mxu0 %v1528_v36  ;;  %1274 = vmatprep.subr.bf16.mxu1 %v1541_v55  ;;  %v1831_v1 = vpack.c.bf16 %v773_v61, %v772_v60 }
  0x29   : > { %v352_v20 = vld [vmem:[%s1712_s20 + $0x2] sm:$0xff]  ;;  %v1464_v22 = vpack.i.bf16 %v1135_v19, %v1134_v17  ;;  %v1727_v23 = vld [vmem:[%s1712_s20 + $0x11] sm:$0xff] }
  0x2a   : > { %v348_v21 = vld [vmem:[%s1712_s20 + $0x1] sm:$0xff]  ;;  %1475 = vrot.lane.b32.xlu1 %v1474_v18, %s1591_s21  ;;  %v1479_v24 = vpack.i.bf16 %v1134_v17, %v352_v20  ;;  %v1733_v26 = vld [vmem:[%s1712_s20 + $0x10] sm:$0xff]  ;;  %v1538_v0 = vld [vmem:[%s1965_s1 + $0x78] sm:$0xff]  }
  0x2b   : > { %1465 = vrot.lane.b32.xlu0 %v1464_v22, %s1592_s22  ;;  %v1469_v25 = vpack.i.bf16 %v1727_v23, %v348_v21  ;;  %v1736_v27 = vld [vmem:[%s1712_s20 + $0x21] sm:$0xff]  ;;  %v1739_v28 = vld [vmem:[%s1712_s20 + $0x31] sm:$0xff]  ;;  %v1489_v32 = vpack.i.bf16 %v1715_v15, %v1733_v26  ;;  %1205 = vmatpush3.bf16.msra.mxu0 %v1529_v37 }
  0x2c   : > { %v1136_v29 = vld [vmem:[%s1712_s20 + $0x32] sm:$0xff]  ;;  %v1749_v33 = vld [vmem:[%s1712_s20 + $0x42] sm:$0xff]  ;;  %v1484_v35 = vpack.i.bf16 %v1739_v28, %v1736_v27  ;;  %1206 = vmatprep.subr.bf16.mxu0 %v1530_v38  ;;  %1275 = vmatpush3.bf16.msra.mxu1 %v1541_v55 }
  0x2d   : > { %v511_v31 = vpack.c.bf16 %v1136_v29, %v1135_v19  ;;  %v1142_v39 = vld [vmem:[%s1712_s20 + $0x40] sm:$0xff]  ;;  %v1494_v40 = vpack.i.bf16 %v1749_v33, %v1136_v29  ;;  %v1143_v41 = vld [vmem:[%s1712_s20 + $0x50] sm:$0xff]  ;;  %v1509_v44 = vpack.i.bf16 %v1136_v29, %v1135_v19  ;;  %1357 = vmatprep.subr.bf16.mxu1 %v1814_v59  ;;  %v775_v3 = vld [vmem:[%s1966_s2 + $0x28] sm:$0xff] }
  0x2e   : > { %1480 = vrot.lane.b32.xlu1 %v1479_v24, %s1591_s21  ;;  %v1780_v45 = vld [vmem:[%s1712_s20 + $0x41] sm:$0xff]  ;;  %v1504_v46 = vpack.i.bf16 %v1143_v41, %v1142_v39  ;;  %v1147_v47 = vld [vmem:[%s1712_s20 + $0x51] sm:$0xff]  ;;  %v1519_v50 = vpack.i.bf16 %v1142_v39, %v1718_v16 }
  0x2f   : > { %1470 = vrot.lane.b32.xlu0 %v1469_v25, %s1592_s22  ;;  %1276 = vmatprep.mubr.msk.bf16.mxu1 %vm482_vm2, %v511_v31  ;;  %v1514_v53 = vpack.i.bf16 %v1147_v47, %v1780_v45  ;;  %v1151_v56 = vld [vmem:[%s1712_s20 + $0x52] sm:$0xff]  ;;  %v774_v2 = vld [vmem:[%s1966_s2 + $0x20] sm:$0xff]  ;;  %v779_v10 = vld [vmem:[%s1966_s2 + $0x48] sm:$0xff] }
  0x30   : > { %1207 = vmatpush3.bf16.msra.mxu0 %v1531_v42  ;;  %v1537_v62 = vld [vmem:[%s1965_s1 + $0x30] sm:$0xff]   ;;  %v514_v63 = vpack.c.bf16 %v1151_v56, %v1749_v33  ;;  %v1540_v4 = vld [vmem:[%s1965_s1 + $0x38] sm:$0xff]   ;;  %v1845_v5 = vpack.c.bf16 %v775_v3, %v774_v2  ;;  %v778_v9 = vld [vmem:[%s1966_s2 + $0x40] sm:$0xff] }
  0x31   : > { %1208 = vmatprep.subr.bf16.mxu0 %v1532_v43  ;;  %v776_v6 = vld [vmem:[%s1966_s2 + $0x30] sm:$0xff]  ;;  %v777_v7 = vld [vmem:[%s1966_s2 + $0x38] sm:$0xff]  ;;  %v1866_v11 = vpack.c.bf16 %v779_v10, %v778_v9  ;;  %v344_v24 = vld [vmem:[%s1712_s20] sm:$0xff] }
  0x32   : > { %1490 = vrot.lane.b32.xlu1 %v1489_v32, %s1593_s15  ;;  %1277 = vmatmul.mubr.msk.bf16.vlgmr.msra.gmra.mrb[0].mxu1 %vm482_vm2, %v514_v63  ;;  %v1856_v8 = vpack.c.bf16 %v777_v7, %v776_v6  ;;  %v780_v12 = vld [vmem:[%s1966_s2 + $0x50] sm:$0xff]  ;;  %v781_v13 = vld [vmem:[%s1966_s2 + $0x58] sm:$0xff] }
  0x33   : > { %1485 = vrot.lane.b32.xlu0 %v1484_v35, %s1593_s15  ;;  %1359 = vmatpush3.bf16.msra.mxu1 %v1814_v59  ;;  %v1876_v14 = vpack.c.bf16 %v781_v13, %v780_v12 }
  0x34   : > { %1209 = vmatpush3.bf16.msra.mxu0 %v1533_v48  ;;  %1361 = vmatprep.subr.bf16.mxu1 %v1831_v1 }
  0x35   : > { %1210 = vmatprep.subr.bf16.mxu0 %v1534_v49 }
  0x36   : > { %1500 = vrot.lane.b32.xlu1 %v1484_v35, %s1592_s22 }
  0x37   : > { %1495 = vrot.lane.b32.xlu0 %v1494_v40, %s1592_s22  ;;  %1363 = vmatpush3.bf16.msra.mxu1 %v1831_v1 }
  0x38   : > { %1211 = vmatpush3.bf16.msra.mxu0 %v1535_v51  ;;  %1365 = vmatprep.subr.bf16.mxu1 %v1845_v5 }
  0x39   : > { %1212 = vmatprep.subr.bf16.mxu0 %v1536_v54 }
  0x3a   : > { %1510 = vrot.lane.b32.xlu1 %v1509_v44, %s1591_s21 }
  0x3b   : > { %1505 = vrot.lane.b32.xlu0 %v1504_v46, %s1591_s21  ;;  %1367 = vmatpush3.bf16.msra.mxu1 %v1845_v5 }
  0x3c   : > { %1213 = vmatpush3.bf16.msra.mxu0 %v1537_v62  ;;  %1369 = vmatprep.subr.bf16.mxu1 %v1856_v8 }
  0x3d   : > { %1214 = vmatprep.subr.bf16.mxu0 %v1538_v0 }
  0x3e   : > { %1520 = vrot.lane.b32.xlu1 %v1519_v50, %s1593_s15 }
  0x3f   : > { %1515 = vrot.lane.b32.xlu0 %v1514_v53, %s1593_s15  ;;  %1371 = vmatpush3.bf16.msra.mxu1 %v1856_v8 }
  0x40   : > { %1215 = vmatpush3.bf16.msra.mxu0 %v1540_v4  ;;  %1373 = vmatprep.subr.bf16.mxu1 %v1866_v11 }
  0x41   : > { %1389 = vmatprep.subr.bf16.mxu0 %v1814_v59 }
  0x43   : > { %1375 = vmatpush3.bf16.msra.mxu1 %v1866_v11 }
  0x44   : > { %1377 = vmatprep.subr.bf16.mxu1 %v1876_v14 }
  0x47   : > { %1379 = vmatpush3.bf16.msra.mxu1 %v1876_v14 }
  0x9c   : > { %v1476_v17 = vpop.permute.xlu1 %1475 }
  0x9d   : > { %v1466_v18 = vpop.permute.xlu0 %1465  ;;  %v1478_v32 = vunpack.i.h.bf16 %v1476_v17  ;;  %v1477_v33 = vunpack.i.l.bf16 %v1476_v17 }
  0x9e   : > { %v1468_v19 = vunpack.i.h.bf16 %v1466_v18  ;;  %v1467_v20 = vunpack.i.l.bf16 %v1466_v18 }
  0xa0   : > { %v1481_v21 = vpop.permute.xlu1 %1480  ;;  %v497_v37 = vsel %vm482_vm2, %v1727_v23, %v1467_v20  ;;  %v498_v38 = vsel %vm482_vm2, %v1736_v27, %v1468_v19 }
  0xa1   : > { %v1471_v22 = vpop.permute.xlu0 %1470  ;;  %v1483_v25 = vunpack.i.h.bf16 %v1481_v21  ;;  %v1482_v29 = vunpack.i.l.bf16 %v1481_v21  ;;  %v501_v47 = vsel %vm487_vm3, %v497_v37, %v1477_v33 }
  0xa2   : > { %v1473_v30 = vunpack.i.h.bf16 %v1471_v22  ;;  %v1472_v31 = vunpack.i.l.bf16 %v1471_v22  ;;  %v782_v22 = vld [vmem:[%s1966_s2 + $0x60] sm:$0xff] }
  0xa4   : > { %v483_v34 = vsel %vm482_vm2, %v344_v24, %v1472_v31  ;;  %v484_v35 = vsel %vm482_vm2, %v1733_v26, %v1473_v30  ;;  %v1491_v36 = vpop.permute.xlu1 %1490  ;;  %v502_v26 = vsel %vm487_vm3, %v498_v38, %v1478_v32 }
  0xa5   : > { %v1493_v39 = vunpack.i.h.bf16 %v1491_v36  ;;  %v1492_v40 = vunpack.i.l.bf16 %v1491_v36  ;;  %v1486_v41 = vpop.permute.xlu0 %1485  ;;  %v488_v44 = vsel %vm487_vm3, %v483_v34, %v1482_v29  ;;  %v489_v46 = vsel %vm487_vm3, %v484_v35, %v1483_v25  ;;  %v1152_v34 = vld [vmem:[%s1967_s3] ss:$0 sm:$0xff] }
  0xa6   : > { %v1488_v42 = vunpack.i.h.bf16 %v1486_v41  ;;  %v1487_v43 = vunpack.i.l.bf16 %v1486_v41 }
  0xa7   : > { %v493_v48 = vsel %vm492_vm4, %v488_v44, %v1492_v40  ;;  %v494_v23 = vsel %vm492_vm4, %v489_v46, %v1493_v39 }
  0xa8   : > { %v1501_v49 = vpop.permute.xlu1 %1500  ;;  %v505_v27 = vsel %vm492_vm4, %v501_v47, %v1487_v43  ;;  %v506_v50 = vsel %vm492_vm4, %v502_v26, %v1488_v42  ;;  %v509_v51 = vpack.c.bf16 %v494_v23, %v493_v48 }
  0xa9   : > { %v1496_v52 = vpop.permute.xlu0 %1495  ;;  %v510_v53 = vpack.c.bf16 %v506_v50, %v505_v27  ;;  %v1503_v54 = vunpack.i.h.bf16 %v1501_v49  ;;  %v1502_v55 = vunpack.i.l.bf16 %v1501_v49 }
  0xaa   : > { %v1498_v57 = vunpack.i.h.bf16 %v1496_v52  ;;  %v1497_v58 = vunpack.i.l.bf16 %v1496_v52 }
  0xab   : > { %704 = vmatprep.mubr.bf16.mxu0 %v510_v53  ;;  %v485_v2 = vsel %vm482_vm2, %v1715_v15, %v1502_v55  ;;  %v486_v3 = vsel %vm482_vm2, %v1718_v16, %v1503_v54 }
  0xac   : > { %705 = vmatmul.mubr.bf16.vlgmr.msra.gmra.mrb[0].mxu0 %v509_v51  ;;  %v1511_v56 = vpop.permute.xlu1 %1510  ;;  %v500_v6 = vsel %vm482_vm2, %v1780_v45, %v1498_v57  ;;  %v499_v7 = vsel %vm482_vm2, %v1739_v28, %v1497_v58 }
  0xad   : > { %v1506_v60 = vpop.permute.xlu0 %1505  ;;  %1391 = vmatpush3.bf16.msra.mxu0 %v1814_v59  ;;  %v1513_v61 = vunpack.i.h.bf16 %v1511_v56  ;;  %v1512_v62 = vunpack.i.l.bf16 %v1511_v56 }
  0xae   : > { %1393 = vmatprep.subr.bf16.mxu0 %v1831_v1  ;;  %v1508_v63 = vunpack.i.h.bf16 %v1506_v60  ;;  %v1507_v0 = vunpack.i.l.bf16 %v1506_v60 }
  0xaf   : > { %v490_v12 = vsel %vm487_vm3, %v485_v2, %v1512_v62  ;;  %v491_v13 = vsel %vm487_vm3, %v486_v3, %v1513_v61 }
  0xb0   : > { %v1521_v4 = vpop.permute.xlu1 %1520  ;;  %v503_v16 = vsel %vm487_vm3, %v499_v7, %v1507_v0  ;;  %v504_v45 = vsel %vm487_vm3, %v500_v6, %v1508_v63 }
  0xb1   : > { %v1523_v59 = vunpack.i.h.bf16 %v1521_v4  ;;  %v1522_v9 = vunpack.i.l.bf16 %v1521_v4  ;;  %v1516_v10 = vpop.permute.xlu0 %1515  ;;  %1395 = vmatpush3.bf16.msra.mxu0 %v1831_v1 }
  0xb2   : > { %v1518_v15 = vunpack.i.h.bf16 %v1516_v10  ;;  %v1517_v17 = vunpack.i.l.bf16 %v1516_v10  ;;  %1397 = vmatprep.subr.bf16.mxu0 %v1845_v5 }
  0xb3   : > { %v495_v18 = vsel %vm492_vm4, %v490_v12, %v1522_v9  ;;  %v496_v28 = vsel %vm492_vm4, %v491_v13, %v1523_v59  ;;  %v1173_v59 = vld [vmem:[%s1968_s4] ss:$0 sm:$0xff] }
  0xb4   : > { %v507_v19 = vsel %vm492_vm4, %v503_v16, %v1517_v17  ;;  %v508_v1 = vsel %vm492_vm4, %v504_v45, %v1518_v15  ;;  %v512_v20 = vpack.c.bf16 %v496_v28, %v495_v18  ;;  %v1174_v17 = vld [vmem:[%s1969_s5] ss:$0 sm:$0xff] }
  0xb5   : > { %v513_v21 = vpack.c.bf16 %v508_v1, %v507_v19  ;;  %1399 = vmatpush3.bf16.msra.mxu0 %v1845_v5  ;;  %v783_v5 = vld [vmem:[%s1966_s2 + $0x68] sm:$0xff] }
  0xb6   : > { %1401 = vmatprep.subr.bf16.mxu0 %v1856_v8  ;;  %v1380_v24 = vpack.c.bf16 %v783_v5, %v782_v22 }
  0xb7   : > { %712 = vmatprep.mubr.bf16.mxu0 %v513_v21 }
  0xb8   : > { %713 = vmatmul.mubr.bf16.gmra.mrb[4].mxu0 %v512_v20  ;;  %1381 = vmatprep.subr.bf16.mxu1 %v1380_v24 }
  0xb9   : > { %1403 = vmatpush3.bf16.msra.mxu0 %v1856_v8  ;;  %1383 = vmatpush3.bf16.msra.mxu1 %v1380_v24  ;;  %v784_v8 = vld [vmem:[%s1966_s2 + $0x70] sm:$0xff] }
  0xba   : > { %1405 = vmatprep.subr.bf16.mxu0 %v1866_v11 }
  0xbd   : > { %1407 = vmatpush3.bf16.msra.mxu0 %v1866_v11  ;;  %v785_v11 = vld [vmem:[%s1966_s2 + $0x78] sm:$0xff] }
  0xbe   : > { %1409 = vmatprep.subr.bf16.mxu0 %v1876_v14 }
  0xc1   : > { %1411 = vmatpush3.bf16.msra.mxu0 %v1876_v14  ;;  %v1384_v14 = vpack.c.bf16 %v785_v11, %v784_v8 }
  0xc2   : > { %1413 = vmatprep.subr.bf16.mxu0 %v1380_v24 }
  0xc3   : > { %1385 = vmatprep.subr.bf16.mxu1 %v1384_v14 }
  0xc4   : > { %1387 = vmatpush3.bf16.msra.mxu1 %v1384_v14 }
  0xc5   : > { %1415 = vmatpush3.bf16.msra.mxu0 %v1380_v24 }
  0xc6   : > { %1417 = vmatprep.subr.bf16.mxu0 %v1384_v14 }
  0xc9   : > { %1419 = vmatpush3.bf16.msra.mxu0 %v1384_v14 }
 0x105   : > { %v1278_v25 = vpop.f32.mrb[0].mxu1 }
 0x106   : > { %v755_v29 = vpop.f32.mrb[1].mxu1 }
 0x107   : > { %v1279_v30 = vpop.f32.mrb[2].mxu1 }
 0x108   : > { %v758_v31 = vpop.f32.mrb[3].mxu1 }
 0x17f   : > { %v1216_v32 = vpop.f32.mrb[0].mxu0 }
 0x180   : > { %v1217_v33 = vpop.f32.mrb[1].mxu0 }
 0x181   : > { %v1218_v35 = vadd.f32 %v1217_v33, %v1216_v32  ;;  %v1219_v36 = vpop.f32.mrb[2].mxu0 }
 0x182   : > { %v1220_v37 = vpop.f32.mrb[3].mxu0 }
 0x183   : > { %v1221_v38 = vadd.f32 %v1220_v37, %v1219_v36  ;;  %v707_v39 = vadd.f32 %v1218_v35, %v1152_v34 }
 0x185   : > { %v756_v40 = vadd.f32 %v755_v29, %v707_v39  ;;  %v710_v41 = vadd.f32 %v1221_v38, %v1152_v34 }
 0x187   : > { %v759_v42 = vadd.f32 %v758_v31, %v710_v41  ;;  %1312 = vmatprep.mubr.f32.mxu1 %v756_v40 }
 0x189   : > { %1313 = vmatmul.mubr.f32.vlgmr.msra.gmra.mrb[4].mxu1 %v759_v42 }
 0x18b   : > { %v1222_v43 = vpop.f32.mrb[4].mxu0 }
 0x18c   : > { %v1223_v44 = vpop.f32.mrb[5].mxu0 }
 0x18d   : > { %v1224_v46 = vadd.f32 %v1223_v44, %v1222_v43  ;;  %v1225_v47 = vpop.f32.mrb[6].mxu0 }
 0x18e   : > { %v1226_v26 = vpop.f32.mrb[7].mxu0 }
 0x18f   : > { %v715_v48 = vadd.f32 %v1224_v46, %v1152_v34  ;;  %v1227_v23 = vadd.f32 %v1226_v26, %v1225_v47 }
 0x191   : > { %v718_v49 = vadd.f32 %v1227_v23, %v1152_v34  ;;  %v764_v27 = vadd.f32 %v1278_v25, %v715_v48 }
 0x193   : > { %1315 = vmatprep.mubr.f32.mxu1 %v764_v27  ;;  %v767_v50 = vadd.f32 %v1279_v30, %v718_v49 }
 0x195   : > { %1316 = vmatmul.mubr.f32.gmra.mrb[6].mxu1 %v767_v50 }
 0x25c   : > { %v1314_v51 = vpop.f32.mrb[4].mxu1 }
 0x25d   : > { %v872_v52 = vsub.f32 %v759_v42, %v1314_v51  ;;  %v852_v53 = vpop.f32.mrb[5].mxu1 }
 0x25e   : > { %v871_v54 = vsub.f32 %v756_v40, %v852_v53 }
 0x25f   : > { %v876_v56 = vmul.f32 %v872_v52, %v872_v52 }
 0x260   : > { %v875_v55 = vmul.f32 %v871_v54, %v871_v54 }
 0x262   : > { %1350 = vmatprep.mubr.f32.mxu0 %v875_v55 }
 0x263   : > { %1351 = vmatmul.mubr.f32.vlgmr.msra.gmra.mrb[8].mxu0 %v876_v56 }
 0x268   : > { %v1317_v57 = vpop.f32.mrb[6].mxu1 }
 0x269   : > { %v874_v58 = vsub.f32 %v767_v50, %v1317_v57  ;;  %v862_v60 = vpop.f32.mrb[7].mxu1 }
 0x26a   : > { %v873_v61 = vsub.f32 %v764_v27, %v862_v60 }
 0x26b   : > { %v878_v63 = vmul.f32 %v874_v58, %v874_v58 }
 0x26c   : > { %v877_v62 = vmul.f32 %v873_v61, %v873_v61 }
 0x26e   : > { %1353 = vmatprep.mubr.f32.mxu0 %v877_v62 }
 0x26f   : > { %1354 = vmatmul.mubr.f32.gmra.mrb[10].mxu0 %v878_v63 }
 0x336   : > { %v1352_v0 = vpop.f32.mrb[8].mxu0 }
 0x337   : > { %v951_v2 = vadd.f32 1e-05, %v1352_v0  ;;  %v945_v3 = vpop.f32.mrb[9].mxu0 }
 0x338   : > { %v946_v4 = vadd.f32 1e-05, %v945_v3 }
 0x339   : > { %1542 = vrsqrt.f32 %v951_v2 }
 0x33a   : > { %1544 = vrsqrt.f32 %v946_v4 }
 0x342   : > { %v1355_v6 = vpop.f32.mrb[10].mxu0 }
 0x343   : > { %v1543_v7 = vpop.eup %1542  ;;  %v961_v9 = vadd.f32 1e-05, %v1355_v6  ;;  %v955_v10 = vpop.f32.mrb[11].mxu0 }
 0x344   : > { %v1545_v12 = vpop.eup %1544  ;;  %v969_v13 = vmul.f32 %v1543_v7, %v872_v52  ;;  %v956_v15 = vadd.f32 1e-05, %v955_v10 }
 0x345   : > { %v968_v16 = vmul.f32 %v1545_v12, %v871_v54  ;;  %1546 = vrsqrt.f32 %v961_v9 }
 0x346   : > { %v980_v45 = vmul.f32 %v1173_v59, %v969_v13  ;;  %1548 = vrsqrt.f32 %v956_v15 }
 0x347   : > { %v979_v18 = vmul.f32 %v1173_v59, %v968_v16 }
 0x348   : > { %v991_v28 = vadd.f32 %v1174_v17, %v980_v45 }
 0x349   : > { %v990_v19 = vadd.f32 %v1174_v17, %v979_v18 }
 0x34a   : > { %vm995_vm5 = vcmp.ge.f32.partialorder %v991_v28, 0.0  ;;  %v999_v1 = vmul.f32 0.2, %v991_v28 }
 0x34b   : > { %vm994_vm6 = vcmp.ge.f32.partialorder %v990_v19, 0.0  ;;  %v998_v20 = vmul.f32 0.2, %v990_v19 }
 0x34c   : > { %v1003_v21 = vsel %vm995_vm5, %v991_v28, %v999_v1 }
 0x34d   : > { %1007 = vst [vmem:[%s1670_s14 + $0x8] sm:$0xff] %v1003_v21  ;;  %v1002_v22 = vsel %vm994_vm6, %v990_v19, %v998_v20 }
 0x34e   : > { %1006 = vst [vmem:[%s1670_s14] sm:$0xff] %v1002_v22 }
 0x34f   : > { %v1547_v5 = vpop.eup %1546 }
 0x350   : > { %v1549_v24 = vpop.eup %1548  ;;  %v971_v8 = vmul.f32 %v1547_v5, %v874_v58 }
 0x351   : > { %v970_v11 = vmul.f32 %v1549_v24, %v873_v61 }
 0x352   : > { %v982_v14 = vmul.f32 %v1173_v59, %v971_v8 }
 0x353   : > { %v981_v25 = vmul.f32 %v1173_v59, %v970_v11 }
 0x354   : > { %v993_v29 = vadd.f32 %v1174_v17, %v982_v14 }
 0x355   : > { %v992_v30 = vadd.f32 %v1174_v17, %v981_v25 }
 0x356   : > { %vm997_vm7 = vcmp.ge.f32.partialorder %v993_v29, 0.0  ;;  %v1001_v31 = vmul.f32 0.2, %v993_v29 }
 0x357   : > { %vm996_vm8 = vcmp.ge.f32.partialorder %v992_v30, 0.0  ;;  %v1000_v32 = vmul.f32 0.2, %v992_v30 }
 0x358   : > { %v1005_v33 = vsel %vm997_vm7, %v993_v29, %v1001_v31 }
 0x359   : > { %1009 = vst [vmem:[%s1670_s14 + $0x18] sm:$0xff] %v1005_v33  ;;  %v1004_v34 = vsel %vm996_vm8, %v992_v30, %v1000_v32 }
 0x35a   : > { %1008 = vst [vmem:[%s1670_s14 + $0x10] sm:$0xff] %v1004_v34 }
 0x35b PF: > { %s16_s25 = sadd.s32 1, %s1588_s25   ;;  %s1971_s21 = smov %s1580_s23 }
 0x35c   : > { %p13_p8 = scmp.ge.s32.totalorder %s16_s25, 6   ;;  %s1972_s22 = smov %s1584_s24 }
 0x35d   : > { %s1973_s23 = smov %s1976_s26  ;;  %s1974_s24 = smov %s1980_s27 }
 0x35e   :  { %15 = sbr.rel (!%p13_p8) target bundleno = 3 (0x3), region = 96 }

</bundles_post_ra>
